<compile_context>
chip_gen: v7x
topology: tpu7x:2x2x1
jax: 0.10.0
libtpu: 0.0.40
codegen_flags: <defaults>
</compile_context>

<pallas_src>
import functools

import jax
import jax.numpy as jnp
from jax.experimental import pallas as pl
from jax.experimental.pallas import tpu as pltpu


def _fusion_kernel(img_ref, txt_ref, w_ref, b_ref, o_ref, *, compute_dtype):
    # img/txt: (TB, D)   w: (2*D, TN)   b: (1, TN)   o: (TB, TN)
    d = img_ref.shape[1]
    img = img_ref[...].astype(compute_dtype)
    txt = txt_ref[...].astype(compute_dtype)
    w_img = w_ref[:d, :].astype(compute_dtype)   # static slices of the tile: free
    w_txt = w_ref[d:, :].astype(compute_dtype)
    acc = jnp.dot(img, w_img, preferred_element_type=jnp.float32)
    acc = acc + jnp.dot(txt, w_txt, preferred_element_type=jnp.float32)
    acc = acc + b_ref[...].astype(jnp.float32)   # (1, TN) broadcasts over TB
    o_ref[...] = acc.astype(o_ref.dtype)


def _divisor_tiles(dim, candidates):
    """All candidates (largest first) that divide `dim`; else the full dim."""
    cands = [c for c in candidates if dim >= c and dim % c == 0]
    return cands if cands else [dim]


def _vmem_budget_bytes():
    try:
        cap = pltpu.get_tpu_info().vmem_capacity_bytes
    except Exception:
        cap = 64 * 1024 * 1024          # conservative: v7x physical VMEM / TC
    return int(cap * 0.8)               # leave headroom for compiler scratch


def _footprint_bytes(tb, tn, d, act_bytes, w_bytes, out_bytes):
    per_step = (2 * tb * d * act_bytes   # img + txt activation tiles
                + 2 * d * tn * w_bytes   # (2*D, TN) weight tile
                + tn * 4                 # bias tile (f32)
                + tb * tn * out_bytes)   # output tile
    return 2 * per_step                  # double buffering


def concat_fusion(img_feat, txt_feat, weight_t, bias, *, tb=None, tn=None,
                  use_bf16_matmul=True):
    """img_feat, txt_feat: [B, D]; weight_t: [2*D, D] (= W.T); bias: [D].

    weight_t may already be stored in bf16 (recommended: the small-batch
    regime is weight-HBM-bandwidth bound); accumulation is always f32.
    """
    B, D = img_feat.shape
    assert txt_feat.shape == (B, D)
    assert weight_t.shape == (2 * D, D)
    assert bias.shape == (D,)

    act_bytes = jnp.dtype(img_feat.dtype).itemsize
    w_bytes = jnp.dtype(weight_t.dtype).itemsize
    out_bytes = act_bytes

    budget = _vmem_budget_bytes()

    # Prefer large TB (MXU row occupancy: up to 256 on v6e/v7x), then the
    # largest lane-dense TN whose double-buffered footprint fits the
    # per-generation VMEM budget.
    tb_cands = [tb] if tb is not None else _divisor_tiles(B, (256, 128, 64, 32, 16, 8))
    tn_cands = [tn] if tn is not None else _divisor_tiles(D, (2048, 1024, 512, 256, 128))
    tb_sel, tn_sel = tb_cands[-1], tn_cands[-1]      # smallest as last resort
    found = False
    for tb_c in tb_cands:
        for tn_c in tn_cands:
            if _footprint_bytes(tb_c, tn_c, D, act_bytes, w_bytes, out_bytes) <= budget:
                tb_sel, tn_sel, found = tb_c, tn_c, True
                break
        if found:
            break
    tb, tn = tb_sel, tn_sel

    bias2d = bias.reshape(1, D)
    compute_dtype = jnp.bfloat16 if use_bf16_matmul else jnp.float32
    kernel = functools.partial(_fusion_kernel, compute_dtype=compute_dtype)

    # Outer axis: output-feature tiles.  Inner axis: batch tiles -> the weight
    # block index is constant across the inner loop, so each weight tile is
    # fetched from HBM exactly once per call.
    grid = (D // tn, B // tb)

    return pl.pallas_call(
        kernel,
        out_shape=jax.ShapeDtypeStruct((B, D), img_feat.dtype),
        grid_spec=pltpu.PrefetchScalarGridSpec(
            num_scalar_prefetch=0,
            grid=grid,
            in_specs=[
                pl.BlockSpec((tb, D), lambda j, i: (i, 0)),       # img activations
                pl.BlockSpec((tb, D), lambda j, i: (i, 0)),       # txt activations
                pl.BlockSpec((2 * D, tn), lambda j, i: (0, j)),   # full W^T, one stream
                pl.BlockSpec((1, tn), lambda j, i: (0, j)),       # bias
            ],
            out_specs=pl.BlockSpec((tb, tn), lambda j, i: (i, j)),
        ),
        compiler_params=pltpu.CompilerParams(
            # No reduction grid axis (K handled whole inside the body) -> both
            # axes parallel, letting v7x shard tiles across its two TCs.
            dimension_semantics=("parallel", "parallel"),
            vmem_limit_bytes=budget,
        ),
    )(img_feat, txt_feat, weight_t, bias2d)


if __name__ == "__main__":
    # Small shapes consistent with the module: latent_dim=256 (default), batch=8.
    B, D = 8, 256
    key = jax.random.PRNGKey(0)
    k_img, k_txt, k_w, k_b = jax.random.split(key, 4)

    img_feat = jax.random.normal(k_img, (B, D), dtype=jnp.float32)
    txt_feat = jax.random.normal(k_txt, (B, D), dtype=jnp.float32)

    # Deterministic parameters mimicking nn.Linear(2*D, D) default init.
    bound = 1.0 / jnp.sqrt(2.0 * D)
    weight = jax.random.uniform(k_w, (D, 2 * D), jnp.float32, -bound, bound)
    bias = jax.random.uniform(k_b, (D,), jnp.float32, -bound, bound)
    weight_t = weight.T  # (2*D, D); a real model would store W^T directly once.

    # Reference: plain JAX cat + linear.
    ref = jnp.concatenate([img_feat, txt_feat], axis=1) @ weight_t + bias

    # 1) Default config (bf16 MXU fast path).  Grid collapses to (1,1) here.
    out = jax.block_until_ready(concat_fusion(img_feat, txt_feat, weight_t, bias))
    assert out.shape == (B, D)
    assert jnp.allclose(out, ref, atol=5e-2, rtol=5e-2)

    # 2) f32 operand path: tight tolerance against the reference.
    out_f32 = jax.block_until_ready(
        concat_fusion(img_feat, txt_feat, weight_t, bias, use_bf16_matmul=False))
    assert jnp.allclose(out_f32, ref, atol=1e-5, rtol=1e-5)

    # 3) Explicit small tiles -> multi-step grid (exercises pipelining and the
    #    weight-resident-across-batch grid-axis order).
    out_tiled = jax.block_until_ready(
        concat_fusion(img_feat, txt_feat, weight_t, bias, tb=8, tn=128,
                      use_bf16_matmul=False))
    assert jnp.allclose(out_tiled, ref, atol=1e-5, rtol=1e-5)

    print("KERNEL_OK")
</pallas_src>

<mosaic_0001>
module attributes {stable_mosaic.version = 11 : i64} {
  func.func @_fusion_kernel(%arg0: i32, %arg1: i32, %arg2: memref<8x256xf32, #tpu.memory_space<vmem>>, %arg3: memref<8x256xf32, #tpu.memory_space<vmem>>, %arg4: memref<512x256xf32, #tpu.memory_space<vmem>>, %arg5: memref<1x256xf32, #tpu.memory_space<vmem>>, %arg6: memref<8x256xf32, #tpu.memory_space<vmem>>) attributes {dimension_semantics = [#tpu.dimension_semantics<parallel>, #tpu.dimension_semantics<parallel>], iteration_bounds = array<i64: 1, 1>, scalar_prefetch = 0 : i64, scratch_operands = 0 : i64, tpu.core_type = #tpu.core_type<tc>, window_params = [{transform_indices = @transform_0, window_bounds = array<i64: 8, 256>}, {transform_indices = @transform_1, window_bounds = array<i64: 8, 256>}, {transform_indices = @transform_2, window_bounds = array<i64: 512, 256>}, {transform_indices = @transform_3, window_bounds = array<i64: 1, 256>}, {transform_indices = @transform_4, window_bounds = array<i64: 8, 256>}]} {
    %c0 = arith.constant 0 : index
    %c0_0 = arith.constant 0 : index
    %0 = vector.load %arg2[%c0, %c0_0] : memref<8x256xf32, #tpu.memory_space<vmem>>, vector<8x256xf32>
    %1 = arith.truncf %0 : vector<8x256xf32> to vector<8x256xbf16>
    %c0_1 = arith.constant 0 : index
    %c0_2 = arith.constant 0 : index
    %2 = vector.load %arg3[%c0_1, %c0_2] : memref<8x256xf32, #tpu.memory_space<vmem>>, vector<8x256xf32>
    %3 = arith.truncf %2 : vector<8x256xf32> to vector<8x256xbf16>
    %c0_3 = arith.constant 0 : index
    %c0_4 = arith.constant 0 : index
    %4 = vector.load %arg4[%c0_3, %c0_4] : memref<512x256xf32, #tpu.memory_space<vmem>>, vector<256x256xf32>
    %5 = arith.truncf %4 : vector<256x256xf32> to vector<256x256xbf16>
    %c256 = arith.constant 256 : index
    %c0_5 = arith.constant 0 : index
    %6 = vector.load %arg4[%c256, %c0_5] : memref<512x256xf32, #tpu.memory_space<vmem>>, vector<256x256xf32>
    %7 = arith.truncf %6 : vector<256x256xf32> to vector<256x256xbf16>
    %cst = arith.constant dense<0.000000e+00> : vector<8x256xf32>
    %8 = tpu.matmul %1, %5, %cst {dimension_numbers = #tpu.dot_dimension_numbers<[1], [0], [0], [1], [0, 0, 1, 1], [], []>} : vector<8x256xbf16>, vector<256x256xbf16>, vector<8x256xf32> -> vector<8x256xf32>
    %cst_6 = arith.constant dense<0.000000e+00> : vector<8x256xf32>
    %9 = tpu.matmul %3, %7, %cst_6 {dimension_numbers = #tpu.dot_dimension_numbers<[1], [0], [0], [1], [0, 0, 1, 1], [], []>} : vector<8x256xbf16>, vector<256x256xbf16>, vector<8x256xf32> -> vector<8x256xf32>
    %10 = arith.addf %8, %9 : vector<8x256xf32>
    %c0_7 = arith.constant 0 : index
    %c0_8 = arith.constant 0 : index
    %11 = vector.load %arg5[%c0_7, %c0_8] : memref<1x256xf32, #tpu.memory_space<vmem>>, vector<1x256xf32>
    %12 = vector.broadcast %11 : vector<1x256xf32> to vector<8x256xf32>
    %13 = arith.addf %10, %12 : vector<8x256xf32>
    %c0_9 = arith.constant 0 : index
    %c0_10 = arith.constant 0 : index
    %14 = vector.load %arg6[%c0_9, %c0_10] : memref<8x256xf32, #tpu.memory_space<vmem>>, vector<8x256xf32>
    tpu.vector_store %arg6[%c0_9, %c0_10], %13 {strides = array<i32>} : memref<8x256xf32, #tpu.memory_space<vmem>>, vector<8x256xf32>,
    return
  }
  func.func @transform_0(%arg0: i32, %arg1: i32) -> (i32, i32) {
    %c0_i32 = arith.constant 0 : i32
    %c0_i32_0 = arith.constant 0 : i32
    return %arg1, %c0_i32 : i32, i32
  }
  func.func @transform_1(%arg0: i32, %arg1: i32) -> (i32, i32) {
    %c0_i32 = arith.constant 0 : i32
    %c0_i32_0 = arith.constant 0 : i32
    return %arg1, %c0_i32 : i32, i32
  }
  func.func @transform_2(%arg0: i32, %arg1: i32) -> (i32, i32) {
    %c0_i32 = arith.constant 0 : i32
    %c0_i32_0 = arith.constant 0 : i32
    return %c0_i32, %arg0 : i32, i32
  }
  func.func @transform_3(%arg0: i32, %arg1: i32) -> (i32, i32) {
    %c0_i32 = arith.constant 0 : i32
    %c0_i32_0 = arith.constant 0 : i32
    return %c0_i32, %arg0 : i32, i32
  }
  func.func @transform_4(%arg0: i32, %arg1: i32) -> (i32, i32) {
    %c0_i32 = arith.constant 0 : i32
    return %arg1, %arg0 : i32, i32
  }
}

</mosaic_0001>

<bundles_post_ra>
// kernel: tpu_custom_call.1
= control target key start
LH: loop header
LB: loop body
LE: loop exit
PB: predicated region body
PF: predicated region fallthrough
CT: control target
= control target key end

     0   :  { %9 = vsyncpa [#allocation3], 0  ;;  %s551_s0 = inlined_call_operand.hbm [shape: f32[8,256], index: 0, kind: input, shape index: {}]   ;;  %s552_s1 = inlined_call_operand.hbm [shape: f32[8,256], index: 1, kind: input, shape index: {}]   ;;  %s553_s2 = inlined_call_operand.hbm [shape: f32[512,256], index: 2, kind: input, shape index: {}]   ;;  %s554_s3 = inlined_call_operand.vmem [shape: f32[1,256], index: 3, kind: input, shape index: {}]   ;;  %s555_s4 = inlined_call_operand.hbm [shape: f32[8,256], index: 4, kind: output, shape index: {}]  }
   0x1   :  { %10 = vsyncpa [#allocation6], 0 }
   0x2   :  { %11 = vsyncpa [#allocation4], 0  ;;  %s469_s15 = smov [#allocation5]   ;;  %s470_s17 = smov [#allocation2]  }
   0x3   :  { %s28_s16 = sshll.u32 %s469_s15, 4  ;;  %s18_s18 = sshll.u32 %s470_s17, 4  ;;  %s29_s16 = int_to_ptr.vmem [resolvable:$true] %s28_s16  ;;  %s19_s18 = int_to_ptr.vmem [resolvable:$true] %s18_s18 }
   0x4   :  { %s375_s21 = scalar_lea.hbm %s552_s1, 256 }
   0x5   :  { %p376_p0 = scmp.ne.s32.totalorder %s552_s1, %s375_s21  ;;  %p379_p1 = scmp.lt.u32.totalorder %s375_s21, %s552_s1 }
   0x7   :  { %p381_p2 = pnand %p379_p1, %p376_p0 }
   0x9   :  { %384 = shalt.err (!%p381_p2)
}
   0xa   :  { %s385_s26 = scalar_lea.vmem %s29_s16, 256  ;;  %p390_p4 = scmp.lt.s32.totalorder %s29_s16, %s29_s16 }
   0xb   :  { %p386_p3 = scmp.ne.s32.totalorder %s29_s16, %s385_s26  ;;  %p391_p5 = scmp.lt.s32.totalorder %s385_s26, %s385_s26 }
   0xd   :  { %p392_p6 = por %p391_p5, %p390_p4 }
   0xf   :  { %p393_p7 = pnand %p392_p6, %p386_p3 }
  0x11   :  { %396 = shalt.err (!%p393_p7)
}
  0x12   :  { %31 = dma.hbm_to_vmem [thread:$0]  %s552_s1, 256, %s29_s16, [#allocation6]  }
  0x13   :  { %s397_s5 = scalar_lea.hbm %s551_s0, 256 }
  0x14   :  { %p398_p8 = scmp.ne.s32.totalorder %s551_s0, %s397_s5  ;;  %p401_p9 = scmp.lt.u32.totalorder %s397_s5, %s551_s0 }
  0x16   :  { %p403_p10 = pnand %p401_p9, %p398_p8 }
  0x18   :  { %406 = shalt.err (!%p403_p10)
}
  0x19   :  { %s407_s10 = scalar_lea.vmem %s19_s18, 256  ;;  %p412_p12 = scmp.lt.s32.totalorder %s19_s18, %s19_s18 }
  0x1a   :  { %p408_p11 = scmp.ne.s32.totalorder %s19_s18, %s407_s10  ;;  %p413_p13 = scmp.lt.s32.totalorder %s407_s10, %s407_s10 }
  0x1c   :  { %p414_p0 = por %p413_p13, %p412_p12 }
  0x1e   :  { %p415_p1 = pnand %p414_p0, %p408_p11 }
  0x20   :  { %418 = shalt.err (!%p415_p1)
}
  0x21   :  { %21 = dma.hbm_to_vmem [thread:$0]  %s551_s0, 256, %s19_s18, [#allocation3]  }
  0x22   :  { %s471_s12 = smov [#allocation7]   ;;  %s419_s16 = scalar_lea.hbm %s553_s2, 16384 }
  0x23   :  { %s37_s13 = sshll.u32 %s471_s12, 4  ;;  %p420_p2 = scmp.ne.s32.totalorder %s553_s2, %s419_s16  ;;  %s38_s13 = int_to_ptr.vmem [resolvable:$true] %s37_s13 }
  0x24   :  { %p423_p3 = scmp.lt.u32.totalorder %s419_s16, %s553_s2 }
  0x26   :  { %p425_p4 = pnand %p423_p3, %p420_p2 }
  0x28   :  { %428 = shalt.err (!%p425_p4)
}
  0x29   :  { %s429_s22 = scalar_lea.vmem %s38_s13, 16384  ;;  %p434_p6 = scmp.lt.s32.totalorder %s38_s13, %s38_s13 }
  0x2a   :  { %p430_p5 = scmp.ne.s32.totalorder %s38_s13, %s429_s22  ;;  %p435_p7 = scmp.lt.s32.totalorder %s429_s22, %s429_s22 }
  0x2c   :  { %p436_p8 = por %p435_p7, %p434_p6 }
  0x2e   :  { %p437_p9 = pnand %p436_p8, %p430_p5 }
  0x30   :  { %440 = shalt.err (!%p437_p9)
}
  0x31   :  { %s472_s0 = smov 256   ;;  %s473_s18 = smov 16  }
  0x32   :  { %43 = dma.hbm_to_vmem [thread:$0]  %s553_s2, 16384, %s38_s13, [#allocation6], %s472_s0, %s472_s0, %s473_s18  }
  0x33   :  { %463 = dma.done.wait [#allocation3], 256  }
  0x34   :  { %464 = vsyncadd [#allocation3], 4294967040 }
  0x35   :  { %465 = dma.done.wait [#allocation6], 16640  }
  0x36   :  { %466 = vsyncadd [#allocation6], 4294950656  ;;  %v160_v0 = vld [vmem:[#allocation7 + $0x208] sm:$0xff]  ;;  %v162_v1 = vld [vmem:[#allocation7 + $0x218] sm:$0xff]  ;;  %s474_s26 = smov [#allocation8]  }
  0x37   :  { %v64_v2 = vld [vmem:[#allocation7 + $0x8] sm:$0xff]  ;;  %v224_v3 = vpack.c.bf16 %v162_v1, %v160_v0  ;;  %v66_v4 = vld [vmem:[#allocation7 + $0x18] sm:$0xff]  ;;  %v159_v5 = vld [vmem:[#allocation7 + $0x200] sm:$0xff]  ;;  %s359_s27 = sshll.u32 %s474_s26, 4  ;;  %s360_s27 = int_to_ptr.vmem [resolvable:$true] %s359_s27 }
  0x38   :  { %v161_v6 = vld [vmem:[#allocation7 + $0x210] sm:$0xff]  ;;  %v128_v7 = vpack.c.bf16 %v66_v4, %v64_v2  ;;  %v63_v9 = vld [vmem:[#allocation7] sm:$0xff]  ;;  %v164_v11 = vld [vmem:[#allocation7 + $0x228] sm:$0xff]  ;;  %p446_p11 = scmp.lt.s32.totalorder %s360_s27, %s360_s27 }
  0x39   :  { %v223_v8 = vpack.c.bf16 %v161_v6, %v159_v5  ;;  %v65_v10 = vld [vmem:[#allocation7 + $0x10] sm:$0xff]  ;;  %255 = vmatprep.subr.bf16.mxu0 %v224_v3  ;;  %v166_v13 = vld [vmem:[#allocation7 + $0x238] sm:$0xff]  ;;  %v68_v14 = vld [vmem:[#allocation7 + $0x28] sm:$0xff] }
  0x3a   :  { %v127_v12 = vpack.c.bf16 %v65_v10, %v63_v9  ;;  %v70_v15 = vld [vmem:[#allocation7 + $0x38] sm:$0xff]  ;;  %296 = vmatprep.subr.bf16.mxu1 %v128_v7  ;;  %v226_v16 = vpack.c.bf16 %v166_v13, %v164_v11  ;;  %v163_v18 = vld [vmem:[#allocation7 + $0x220] sm:$0xff]  ;;  %v165_v19 = vld [vmem:[#allocation7 + $0x230] sm:$0xff] }
  0x3b   :  { %256 = vmatpush1.bf16.msra.mxu0 %v223_v8  ;;  %v130_v17 = vpack.c.bf16 %v70_v15, %v68_v14  ;;  %v67_v20 = vld [vmem:[#allocation7 + $0x20] sm:$0xff]  ;;  %v225_v21 = vpack.c.bf16 %v165_v19, %v163_v18  ;;  %v69_v22 = vld [vmem:[#allocation7 + $0x30] sm:$0xff]  ;;  %v168_v23 = vld [vmem:[#allocation7 + $0x248] sm:$0xff] }
  0x3c   :  { %297 = vmatpush1.bf16.msra.mxu1 %v127_v12  ;;  %v170_v24 = vld [vmem:[#allocation7 + $0x258] sm:$0xff]  ;;  %257 = vmatprep.subr.bf16.mxu0 %v226_v16  ;;  %v129_v25 = vpack.c.bf16 %v69_v22, %v67_v20  ;;  %v72_v27 = vld [vmem:[#allocation7 + $0x48] sm:$0xff]  ;;  %v167_v29 = vld [vmem:[#allocation7 + $0x240] sm:$0xff] }
  0x3d   :  { %298 = vmatprep.subr.bf16.mxu1 %v130_v17  ;;  %v228_v26 = vpack.c.bf16 %v170_v24, %v168_v23  ;;  %v74_v28 = vld [vmem:[#allocation7 + $0x58] sm:$0xff]  ;;  %v169_v31 = vld [vmem:[#allocation7 + $0x250] sm:$0xff]  ;;  %v71_v32 = vld [vmem:[#allocation7 + $0x40] sm:$0xff] }
  0x3e   :  { %v132_v30 = vpack.c.bf16 %v74_v28, %v72_v27  ;;  %v73_v33 = vld [vmem:[#allocation7 + $0x50] sm:$0xff]  ;;  %v227_v34 = vpack.c.bf16 %v169_v31, %v167_v29  ;;  %v172_v35 = vld [vmem:[#allocation7 + $0x268] sm:$0xff]  ;;  %v174_v36 = vld [vmem:[#allocation7 + $0x278] sm:$0xff] }
  0x3f   :  { %258 = vmatpush1.bf16.msra.mxu0 %v225_v21  ;;  %v76_v37 = vld [vmem:[#allocation7 + $0x68] sm:$0xff]  ;;  %v131_v38 = vpack.c.bf16 %v73_v33, %v71_v32  ;;  %v230_v39 = vpack.c.bf16 %v174_v36, %v172_v35  ;;  %v78_v40 = vld [vmem:[#allocation7 + $0x78] sm:$0xff]  ;;  %v171_v41 = vld [vmem:[#allocation7 + $0x260] sm:$0xff] }
  0x40   :  { %299 = vmatpush1.bf16.msra.mxu1 %v129_v25  ;;  %259 = vmatprep.subr.bf16.mxu0 %v228_v26  ;;  %v173_v42 = vld [vmem:[#allocation7 + $0x270] sm:$0xff]  ;;  %v134_v43 = vpack.c.bf16 %v78_v40, %v76_v37  ;;  %v75_v44 = vld [vmem:[#allocation7 + $0x60] sm:$0xff]  ;;  %v176_v46 = vld [vmem:[#allocation7 + $0x288] sm:$0xff] }
  0x41   :  { %300 = vmatprep.subr.bf16.mxu1 %v132_v30  ;;  %v77_v45 = vld [vmem:[#allocation7 + $0x70] sm:$0xff]  ;;  %v178_v47 = vld [vmem:[#allocation7 + $0x298] sm:$0xff]  ;;  %v80_v48 = vld [vmem:[#allocation7 + $0x88] sm:$0xff]  ;;  %v229_v50 = vpack.c.bf16 %v173_v42, %v171_v41 }
  0x42   :  { %v82_v49 = vld [vmem:[#allocation7 + $0x98] sm:$0xff]  ;;  %v133_v51 = vpack.c.bf16 %v77_v45, %v75_v44  ;;  %v232_v52 = vpack.c.bf16 %v178_v47, %v176_v46  ;;  %v175_v53 = vld [vmem:[#allocation7 + $0x280] sm:$0xff]  ;;  %v177_v54 = vld [vmem:[#allocation7 + $0x290] sm:$0xff] }
  0x43   :  { %260 = vmatpush1.bf16.msra.mxu0 %v227_v34  ;;  %v79_v55 = vld [vmem:[#allocation7 + $0x80] sm:$0xff]  ;;  %v136_v56 = vpack.c.bf16 %v82_v49, %v80_v48  ;;  %v81_v57 = vld [vmem:[#allocation7 + $0x90] sm:$0xff]  ;;  %v180_v58 = vld [vmem:[#allocation7 + $0x2a8] sm:$0xff]  ;;  %v231_v62 = vpack.c.bf16 %v177_v54, %v175_v53 }
  0x44   :  { %301 = vmatpush1.bf16.msra.mxu1 %v131_v38  ;;  %261 = vmatprep.subr.bf16.mxu0 %v230_v39  ;;  %v182_v59 = vld [vmem:[#allocation7 + $0x2b8] sm:$0xff]  ;;  %v84_v60 = vld [vmem:[#allocation7 + $0xa8] sm:$0xff]  ;;  %v135_v63 = vpack.c.bf16 %v81_v57, %v79_v55  ;;  %v179_v1 = vld [vmem:[#allocation7 + $0x2a0] sm:$0xff] }
  0x45   :  { %302 = vmatprep.subr.bf16.mxu1 %v134_v43  ;;  %v86_v61 = vld [vmem:[#allocation7 + $0xb8] sm:$0xff]  ;;  %v234_v0 = vpack.c.bf16 %v182_v59, %v180_v58  ;;  %v181_v2 = vld [vmem:[#allocation7 + $0x2b0] sm:$0xff]  ;;  %v83_v3 = vld [vmem:[#allocation7 + $0xa0] sm:$0xff] }
  0x46   :  { %v138_v4 = vpack.c.bf16 %v86_v61, %v84_v60  ;;  %v85_v5 = vld [vmem:[#allocation7 + $0xb0] sm:$0xff]  ;;  %v184_v6 = vld [vmem:[#allocation7 + $0x2c8] sm:$0xff]  ;;  %v186_v7 = vld [vmem:[#allocation7 + $0x2d8] sm:$0xff]  ;;  %v233_v10 = vpack.c.bf16 %v181_v2, %v179_v1 }
  0x47   :  { %262 = vmatpush1.bf16.msra.mxu0 %v229_v50  ;;  %v88_v8 = vld [vmem:[#allocation7 + $0xc8] sm:$0xff]  ;;  %v90_v9 = vld [vmem:[#allocation7 + $0xd8] sm:$0xff]  ;;  %v137_v11 = vpack.c.bf16 %v85_v5, %v83_v3  ;;  %v236_v12 = vpack.c.bf16 %v186_v7, %v184_v6  ;;  %v183_v13 = vld [vmem:[#allocation7 + $0x2c0] sm:$0xff] }
  0x48   :  { %303 = vmatpush1.bf16.msra.mxu1 %v133_v51  ;;  %263 = vmatprep.subr.bf16.mxu0 %v232_v52  ;;  %v185_v14 = vld [vmem:[#allocation7 + $0x2d0] sm:$0xff]  ;;  %v87_v15 = vld [vmem:[#allocation7 + $0xc0] sm:$0xff]  ;;  %v140_v16 = vpack.c.bf16 %v90_v9, %v88_v8  ;;  %v188_v18 = vld [vmem:[#allocation7 + $0x2e8] sm:$0xff] }
  0x49   :  { %304 = vmatprep.subr.bf16.mxu1 %v136_v56  ;;  %v89_v17 = vld [vmem:[#allocation7 + $0xd0] sm:$0xff]  ;;  %v190_v19 = vld [vmem:[#allocation7 + $0x2f8] sm:$0xff]  ;;  %v92_v20 = vld [vmem:[#allocation7 + $0xe8] sm:$0xff]  ;;  %v235_v22 = vpack.c.bf16 %v185_v14, %v183_v13 }
  0x4a   :  { %v94_v21 = vld [vmem:[#allocation7 + $0xf8] sm:$0xff]  ;;  %v139_v23 = vpack.c.bf16 %v89_v17, %v87_v15  ;;  %v238_v24 = vpack.c.bf16 %v190_v19, %v188_v18  ;;  %v187_v25 = vld [vmem:[#allocation7 + $0x2e0] sm:$0xff]  ;;  %v189_v26 = vld [vmem:[#allocation7 + $0x2f0] sm:$0xff] }
  0x4b   :  { %264 = vmatpush1.bf16.msra.mxu0 %v231_v62  ;;  %v91_v27 = vld [vmem:[#allocation7 + $0xe0] sm:$0xff]  ;;  %v142_v28 = vpack.c.bf16 %v94_v21, %v92_v20  ;;  %v93_v29 = vld [vmem:[#allocation7 + $0xf0] sm:$0xff]  ;;  %v192_v30 = vld [vmem:[#allocation7 + $0x308] sm:$0xff]  ;;  %v237_v34 = vpack.c.bf16 %v189_v26, %v187_v25 }
  0x4c   :  { %305 = vmatpush1.bf16.msra.mxu1 %v135_v63  ;;  %265 = vmatprep.subr.bf16.mxu0 %v234_v0  ;;  %v194_v31 = vld [vmem:[#allocation7 + $0x318] sm:$0xff]  ;;  %v96_v32 = vld [vmem:[#allocation7 + $0x108] sm:$0xff]  ;;  %v141_v35 = vpack.c.bf16 %v93_v29, %v91_v27  ;;  %v191_v37 = vld [vmem:[#allocation7 + $0x300] sm:$0xff] }
  0x4d   :  { %306 = vmatprep.subr.bf16.mxu1 %v138_v4  ;;  %v98_v33 = vld [vmem:[#allocation7 + $0x118] sm:$0xff]  ;;  %v240_v36 = vpack.c.bf16 %v194_v31, %v192_v30  ;;  %v193_v38 = vld [vmem:[#allocation7 + $0x310] sm:$0xff]  ;;  %v95_v39 = vld [vmem:[#allocation7 + $0x100] sm:$0xff] }
  0x4e   :  { %v144_v40 = vpack.c.bf16 %v98_v33, %v96_v32  ;;  %v97_v41 = vld [vmem:[#allocation7 + $0x110] sm:$0xff]  ;;  %v196_v42 = vld [vmem:[#allocation7 + $0x328] sm:$0xff]  ;;  %v198_v43 = vld [vmem:[#allocation7 + $0x338] sm:$0xff]  ;;  %v239_v46 = vpack.c.bf16 %v193_v38, %v191_v37 }
  0x4f   :  { %266 = vmatpush1.bf16.msra.mxu0 %v233_v10  ;;  %v100_v44 = vld [vmem:[#allocation7 + $0x128] sm:$0xff]  ;;  %v102_v45 = vld [vmem:[#allocation7 + $0x138] sm:$0xff]  ;;  %v143_v47 = vpack.c.bf16 %v97_v41, %v95_v39  ;;  %v242_v48 = vpack.c.bf16 %v198_v43, %v196_v42  ;;  %v195_v49 = vld [vmem:[#allocation7 + $0x320] sm:$0xff] }
  0x50   :  { %307 = vmatpush1.bf16.msra.mxu1 %v137_v11  ;;  %267 = vmatprep.subr.bf16.mxu0 %v236_v12  ;;  %v197_v50 = vld [vmem:[#allocation7 + $0x330] sm:$0xff]  ;;  %v99_v51 = vld [vmem:[#allocation7 + $0x120] sm:$0xff]  ;;  %v146_v52 = vpack.c.bf16 %v102_v45, %v100_v44  ;;  %v200_v54 = vld [vmem:[#allocation7 + $0x348] sm:$0xff] }
  0x51   :  { %308 = vmatprep.subr.bf16.mxu1 %v140_v16  ;;  %v101_v53 = vld [vmem:[#allocation7 + $0x130] sm:$0xff]  ;;  %v202_v55 = vld [vmem:[#allocation7 + $0x358] sm:$0xff]  ;;  %v104_v56 = vld [vmem:[#allocation7 + $0x148] sm:$0xff]  ;;  %v241_v58 = vpack.c.bf16 %v197_v50, %v195_v49 }
  0x52   :  { %v106_v57 = vld [vmem:[#allocation7 + $0x158] sm:$0xff]  ;;  %v145_v59 = vpack.c.bf16 %v101_v53, %v99_v51  ;;  %v244_v60 = vpack.c.bf16 %v202_v55, %v200_v54  ;;  %v199_v61 = vld [vmem:[#allocation7 + $0x340] sm:$0xff]  ;;  %v201_v62 = vld [vmem:[#allocation7 + $0x350] sm:$0xff] }
  0x53   :  { %268 = vmatpush1.bf16.msra.mxu0 %v235_v22  ;;  %v103_v63 = vld [vmem:[#allocation7 + $0x140] sm:$0xff]  ;;  %v148_v0 = vpack.c.bf16 %v106_v57, %v104_v56  ;;  %v105_v1 = vld [vmem:[#allocation7 + $0x150] sm:$0xff]  ;;  %v204_v2 = vld [vmem:[#allocation7 + $0x368] sm:$0xff]  ;;  %v243_v6 = vpack.c.bf16 %v201_v62, %v199_v61 }
  0x54   :  { %309 = vmatpush1.bf16.msra.mxu1 %v139_v23  ;;  %269 = vmatprep.subr.bf16.mxu0 %v238_v24  ;;  %v206_v3 = vld [vmem:[#allocation7 + $0x378] sm:$0xff]  ;;  %v108_v4 = vld [vmem:[#allocation7 + $0x168] sm:$0xff]  ;;  %v203_v7 = vld [vmem:[#allocation7 + $0x360] sm:$0xff]  ;;  %v147_v8 = vpack.c.bf16 %v105_v1, %v103_v63 }
  0x55   :  { %310 = vmatprep.subr.bf16.mxu1 %v142_v28  ;;  %v110_v5 = vld [vmem:[#allocation7 + $0x178] sm:$0xff]  ;;  %v246_v9 = vpack.c.bf16 %v206_v3, %v204_v2  ;;  %v205_v10 = vld [vmem:[#allocation7 + $0x370] sm:$0xff]  ;;  %v107_v11 = vld [vmem:[#allocation7 + $0x160] sm:$0xff] }
  0x56   :  { %v109_v12 = vld [vmem:[#allocation7 + $0x170] sm:$0xff]  ;;  %v150_v13 = vpack.c.bf16 %v110_v5, %v108_v4  ;;  %v208_v14 = vld [vmem:[#allocation7 + $0x388] sm:$0xff]  ;;  %v210_v15 = vld [vmem:[#allocation7 + $0x398] sm:$0xff]  ;;  %v245_v21 = vpack.c.bf16 %v205_v10, %v203_v7 }
  0x57   :  { %270 = vmatpush1.bf16.msra.mxu0 %v237_v34  ;;  %v60_v16 = vld [vmem:[#allocation5 + $0x8] sm:$0xff]  ;;  %v112_v17 = vld [vmem:[#allocation7 + $0x188] sm:$0xff]  ;;  %v149_v23 = vpack.c.bf16 %v109_v12, %v107_v11  ;;  %v248_v24 = vpack.c.bf16 %v210_v15, %v208_v14  ;;  %v207_v25 = vld [vmem:[#allocation7 + $0x380] sm:$0xff] }
  0x58   :  { %311 = vmatpush1.bf16.msra.mxu1 %v141_v35  ;;  %271 = vmatprep.subr.bf16.mxu0 %v240_v36  ;;  %v114_v18 = vld [vmem:[#allocation7 + $0x198] sm:$0xff]  ;;  %v62_v19 = vpack.c.bf16 %v60_v16, %v60_v16  ;;  %v56_v20 = vld [vmem:[#allocation2 + $0x8] sm:$0xff]  ;;  %v209_v26 = vld [vmem:[#allocation7 + $0x390] sm:$0xff] }
  0x59   :  { %312 = vmatprep.subr.bf16.mxu1 %v144_v40  ;;  %v58_v22 = vpack.c.bf16 %v56_v20, %v56_v20  ;;  %v111_v27 = vld [vmem:[#allocation7 + $0x180] sm:$0xff]  ;;  %v152_v28 = vpack.c.bf16 %v114_v18, %v112_v17  ;;  %v113_v29 = vld [vmem:[#allocation7 + $0x190] sm:$0xff]  ;;  %v212_v30 = vld [vmem:[#allocation7 + $0x3a8] sm:$0xff]  ;;  %v247_v34 = vpack.c.bf16 %v209_v26, %v207_v25 }
  0x5a   :  { %v214_v31 = vld [vmem:[#allocation7 + $0x3b8] sm:$0xff]  ;;  %287 = vmatprep.mubr.bf16.mxu0 %v62_v19  ;;  %v116_v32 = vld [vmem:[#allocation7 + $0x1a8] sm:$0xff]  ;;  %v151_v35 = vpack.c.bf16 %v113_v29, %v111_v27  ;;  %v211_v37 = vld [vmem:[#allocation7 + $0x3a0] sm:$0xff] }
  0x5b   :  { %272 = vmatpush1.bf16.msra.mxu0 %v239_v46  ;;  %v118_v33 = vld [vmem:[#allocation7 + $0x1b8] sm:$0xff]  ;;  %328 = vmatprep.mubr.bf16.mxu1 %v58_v22  ;;  %v250_v36 = vpack.c.bf16 %v214_v31, %v212_v30  ;;  %v213_v38 = vld [vmem:[#allocation7 + $0x3b0] sm:$0xff]  ;;  %v115_v39 = vld [vmem:[#allocation7 + $0x1a0] sm:$0xff] }
  0x5c   :  { %313 = vmatpush1.bf16.msra.mxu1 %v143_v47  ;;  %273 = vmatprep.subr.bf16.mxu0 %v242_v48  ;;  %v154_v40 = vpack.c.bf16 %v118_v33, %v116_v32  ;;  %v117_v41 = vld [vmem:[#allocation7 + $0x1b0] sm:$0xff]  ;;  %v216_v42 = vld [vmem:[#allocation7 + $0x3c8] sm:$0xff]  ;;  %v218_v43 = vld [vmem:[#allocation7 + $0x3d8] sm:$0xff]  ;;  %v249_v46 = vpack.c.bf16 %v213_v38, %v211_v37 }
  0x5d   :  { %314 = vmatprep.subr.bf16.mxu1 %v146_v52  ;;  %v120_v44 = vld [vmem:[#allocation7 + $0x1c8] sm:$0xff]  ;;  %v122_v45 = vld [vmem:[#allocation7 + $0x1d8] sm:$0xff]  ;;  %v153_v47 = vpack.c.bf16 %v117_v41, %v115_v39  ;;  %v252_v48 = vpack.c.bf16 %v218_v43, %v216_v42  ;;  %v215_v49 = vld [vmem:[#allocation7 + $0x3c0] sm:$0xff] }
  0x5e   :  { %v217_v50 = vld [vmem:[#allocation7 + $0x3d0] sm:$0xff]  ;;  %v119_v51 = vld [vmem:[#allocation7 + $0x1c0] sm:$0xff]  ;;  %v156_v52 = vpack.c.bf16 %v122_v45, %v120_v44  ;;  %v220_v54 = vld [vmem:[#allocation7 + $0x3e8] sm:$0xff] }
  0x5f   :  { %274 = vmatpush1.bf16.msra.mxu0 %v241_v58  ;;  %v121_v53 = vld [vmem:[#allocation7 + $0x1d0] sm:$0xff]  ;;  %v222_v55 = vld [vmem:[#allocation7 + $0x3f8] sm:$0xff]  ;;  %v124_v56 = vld [vmem:[#allocation7 + $0x1e8] sm:$0xff]  ;;  %v251_v58 = vpack.c.bf16 %v217_v50, %v215_v49 }
  0x60   :  { %315 = vmatpush1.bf16.msra.mxu1 %v145_v59  ;;  %275 = vmatprep.subr.bf16.mxu0 %v244_v60  ;;  %v126_v57 = vld [vmem:[#allocation7 + $0x1f8] sm:$0xff]  ;;  %v155_v59 = vpack.c.bf16 %v121_v53, %v119_v51  ;;  %v254_v60 = vpack.c.bf16 %v222_v55, %v220_v54  ;;  %v219_v61 = vld [vmem:[#allocation7 + $0x3e0] sm:$0xff]  ;;  %v221_v62 = vld [vmem:[#allocation7 + $0x3f0] sm:$0xff] }
  0x61   :  { %316 = vmatprep.subr.bf16.mxu1 %v148_v0  ;;  %v158_v63 = vpack.c.bf16 %v126_v57, %v124_v56  ;;  %v123_v0 = vld [vmem:[#allocation7 + $0x1e0] sm:$0xff]  ;;  %v125_v1 = vld [vmem:[#allocation7 + $0x1f0] sm:$0xff]  ;;  %v253_v2 = vpack.c.bf16 %v221_v62, %v219_v61 }
  0x62   :  { %v59_v3 = vld [vmem:[#allocation5] sm:$0xff]  ;;  %v157_v4 = vpack.c.bf16 %v125_v1, %v123_v0  ;;  %v55_v5 = vld [vmem:[#allocation2] sm:$0xff] }
  0x63   :  { %276 = vmatpush1.bf16.msra.mxu0 %v243_v6  ;;  %v61_v6 = vpack.c.bf16 %v59_v3, %v59_v3  ;;  %v57_v7 = vpack.c.bf16 %v55_v5, %v55_v5  ;;  %v337_v11 = vld [vmem:[%s554_s3] sm:$0x3]  ;;  %s441_s3 = scalar_lea.vmem %s360_s27, 256 }
  0x64   :  { %317 = vmatpush1.bf16.msra.mxu1 %v147_v8  ;;  %277 = vmatprep.subr.bf16.mxu0 %v246_v9  ;;  %v339_v8 = vlaneseq  ;;  %p442_p10 = scmp.ne.s32.totalorder %s360_s27, %s441_s3  ;;  %p447_p12 = scmp.lt.s32.totalorder %s441_s3, %s441_s3 }
  0x65   :  { %318 = vmatprep.subr.bf16.mxu1 %v150_v13 }
  0x66   :  { %v340_v9 = vshrl.u32 %v339_v8, 7  ;;  %p448_p13 = por %p447_p12, %p446_p11 }
  0x67   :  { %278 = vmatpush1.bf16.msra.mxu0 %v245_v21 }
  0x68   :  { %319 = vmatpush1.bf16.msra.mxu1 %v149_v23  ;;  %279 = vmatprep.subr.bf16.mxu0 %v248_v24  ;;  %v341_v10 = vsub.s32 0, %v340_v9  ;;  %v345_v12 = vsub.s32 1, %v340_v9  ;;  %p449_p0 = pnand %p448_p13, %p442_p10 }
  0x69   :  { %320 = vmatprep.subr.bf16.mxu1 %v152_v28 }
  0x6a   :  { %v342_v14 = vrot.slane %v337_v11, %v341_v10  ;;  %v346_v17 = vrot.slane %v337_v11, %v345_v12 }
  0x6b   :  { %280 = vmatpush1.bf16.msra.mxu0 %v247_v34 }
  0x6c   :  { %321 = vmatpush1.bf16.msra.mxu1 %v151_v35  ;;  %281 = vmatprep.subr.bf16.mxu0 %v250_v36 }
  0x6d   :  { %322 = vmatprep.subr.bf16.mxu1 %v154_v40 }
  0x6f   :  { %282 = vmatpush1.bf16.msra.mxu0 %v249_v46 }
  0x70   :  { %323 = vmatpush1.bf16.msra.mxu1 %v153_v47  ;;  %283 = vmatprep.subr.bf16.mxu0 %v252_v48 }
  0x71   :  { %324 = vmatprep.subr.bf16.mxu1 %v156_v52 }
  0x73   :  { %284 = vmatpush1.bf16.msra.mxu0 %v251_v58 }
  0x74   :  { %325 = vmatpush1.bf16.msra.mxu1 %v155_v59  ;;  %285 = vmatprep.subr.bf16.mxu0 %v254_v60 }
  0x75   :  { %326 = vmatprep.subr.bf16.mxu1 %v158_v63 }
  0x77   :  { %286 = vmatpush1.bf16.msra.mxu0 %v253_v2 }
  0x78   :  { %327 = vmatpush1.bf16.msra.mxu1 %v157_v4 }
  0x7a   :  { %288 = vmatmul.mubr.bf16.vlgmr.msra.gmra.mrb[0].mxu0 %v61_v6 }
  0x7b   :  { %329 = vmatmul.mubr.bf16.vlgmr.msra.gmra.mrb[0].mxu1 %v57_v7 }
 0x14d   :  { %v289_v13 = vpop.f32.mrb[0].mxu0 }
 0x14e   :  { %v330_v15 = vpop.f32.mrb[0].mxu1  ;;  %v291_v16 = vpop.f32.mrb[1].mxu0 }
 0x14f   :  { %v331_v18 = vadd.f32 %v330_v15, %v289_v13  ;;  %v332_v19 = vpop.f32.mrb[1].mxu1  ;;  %v293_v20 = vpop.f32.mrb[2].mxu0 }
 0x150   :  { %v333_v21 = vadd.f32 %v332_v19, %v291_v16  ;;  %v334_v22 = vpop.f32.mrb[2].mxu1  ;;  %v294_v23 = vpop.f32.mrb[3].mxu0 }
 0x151   :  { %v349_v24 = vadd.f32 %v342_v14, %v331_v18  ;;  %v335_v25 = vpop.f32.mrb[3].mxu1 }
 0x152   :  { %v350_v26 = vadd.f32 %v346_v17, %v333_v21 }
 0x153   :  { %351 = vst [vmem:[#allocation8] sm:$0xff] %v349_v24 }
 0x154   :  { %352 = vst [vmem:[#allocation8 + $0x8] sm:$0xff] %v350_v26 }
 0x155   :  { %452 = shalt.err (!%p449_p0)
}
 0x156   :  { %s453_s30 = scalar_lea.hbm %s555_s4, 256 }
 0x157   :  { %p454_p1 = scmp.ne.s32.totalorder %s555_s4, %s453_s30  ;;  %p457_p2 = scmp.lt.u32.totalorder %s453_s30, %s555_s4 }
 0x159   :  { %p459_p3 = pnand %p457_p2, %p454_p1 }
 0x15b   :  { %462 = shalt.err (!%p459_p3)
}
 0x15c   :  { %362 = dma.vmem_to_hbm [thread:$0]  %s360_s27, 256, %s555_s4, [#allocation4]  }
 0x15d   :  { %467 = dma.done.wait [#allocation4], 256  }
 0x15e   :  { %468 = vsyncadd [#allocation4], 4294967040 }
 0x15f   :  { %366 = vsyncpa [#allocation3], 1 }
 0x160   :  { %367 = vsyncpa [#allocation6], 1 }
 0x161   :  { %368 = vsyncpa [#allocation4], 1 }

</bundles_post_ra>
